<compile_context>
chip_gen: v6e
topology: v6e:2x2x1
jax: 0.10.0
libtpu: 0.0.40
codegen_flags: <defaults>
</compile_context>

<pallas_src>
import functools

import jax
import jax.numpy as jnp
from jax.experimental import pallas as pl
from jax.experimental.pallas import tpu as pltpu


def _gather_pair_rows(idx_ref, table_ref, base, block_rows):
    """Gather block_rows rows for commander 0 and commander 1 -> two (G, D) tiles."""
    rows0, rows1 = [], []
    for g in range(block_rows):            # static, tiny unrolled loop
        r = base + g
        rows0.append(table_ref[pl.ds(idx_ref[r, 0], 1), :])
        rows1.append(table_ref[pl.ds(idx_ref[r, 1], 1), :])
    e0 = jnp.concatenate(rows0, axis=0)     # (G, D)
    e1 = jnp.concatenate(rows1, axis=0)     # (G, D)
    return e0, e1


def _commander_eval_kernel(idx_ref, table_ref, wt_ref, b_ref, out_ref, *,
                           block_rows, embed_dim):
    base = pl.program_id(0) * block_rows
    e0, e1 = _gather_pair_rows(idx_ref, table_ref, base, block_rows)
    w0 = wt_ref[:embed_dim, :]              # static slices of the VMEM view
    w1 = wt_ref[embed_dim:, :]
    out = (jnp.dot(e0, w0, preferred_element_type=jnp.float32)
           + jnp.dot(e1, w1, preferred_element_type=jnp.float32)
           + b_ref[...])
    out_ref[...] = out.astype(out_ref.dtype)


def _commander_train_kernel(idx_ref, table_ref, wt_ref, b_ref, mask_ref, out_ref, *,
                            block_rows, embed_dim):
    base = pl.program_id(0) * block_rows
    e0, e1 = _gather_pair_rows(idx_ref, table_ref, base, block_rows)
    w0 = wt_ref[:embed_dim, :]
    w1 = wt_ref[embed_dim:, :]
    out = (jnp.dot(e0, w0, preferred_element_type=jnp.float32)
           + jnp.dot(e1, w1, preferred_element_type=jnp.float32)
           + b_ref[...])
    # Inverted dropout fused with the output store (mask already scaled by 1/keep).
    out_ref[...] = (out * mask_ref[...]).astype(out_ref.dtype)


def commander_embedding(x, table, weight, bias, *, dropout_rate=0.2,
                        training=False, rng_key=None, block_rows=8):
    """Forward pass of CommanderEmbedding.

    Args:
      x:      (B, 2) int32 commander id pairs.
      table:  (C, D) float32 embedding weight.
      weight: (D, 2*D) float32 combine Linear weight (torch layout: out x in).
      bias:   (D,)   float32 combine Linear bias.
      training: if True, apply inverted dropout (mask from jax.random).
    Returns:
      (B, D) float32.
    """
    x = jnp.asarray(x, jnp.int32)
    B = x.shape[0]
    C, D = table.shape
    assert weight.shape == (D, 2 * D), "combine weight must be (D, 2D)"

    # Clamp indices: Mosaic performs no runtime bounds check on dynamic slices.
    x = jnp.clip(x, 0, C - 1)

    # Table + combine weight are kept VMEM-resident (fetched from HBM once).
    # TODO(synk): fall back to a per-row manual-DMA gather if the table ever
    # approaches the scoped VMEM budget (~32 MiB default, 64 MiB physical on v7x).

    wt = jnp.transpose(weight)                       # (2D, D): kernel computes e @ W^T
    b2 = jnp.reshape(bias, (1, D)).astype(table.dtype)

    # Pad batch so every grid step is a full sublane-dense (block_rows, D) tile.
    Bp = ((B + block_rows - 1) // block_rows) * block_rows
    if Bp != B:
        x = jnp.pad(x, ((0, Bp - B), (0, 0)))

    grid = (Bp // block_rows,)
    table_spec = pl.BlockSpec((C, D), lambda i, idx: (0, 0))
    wt_spec = pl.BlockSpec((2 * D, D), lambda i, idx: (0, 0))
    b_spec = pl.BlockSpec((1, D), lambda i, idx: (0, 0))
    out_spec = pl.BlockSpec((block_rows, D), lambda i, idx: (i, 0))
    out_shape = jax.ShapeDtypeStruct((Bp, D), table.dtype)
    cparams = pltpu.CompilerParams(dimension_semantics=("parallel",))

    if (not training) or dropout_rate <= 0.0:
        kernel = functools.partial(_commander_eval_kernel,
                                   block_rows=block_rows, embed_dim=D)
        grid_spec = pltpu.PrefetchScalarGridSpec(
            num_scalar_prefetch=1,
            grid=grid,
            in_specs=[table_spec, wt_spec, b_spec],
            out_specs=out_spec,
        )
        out = pl.pallas_call(
            kernel, out_shape=out_shape, grid_spec=grid_spec,
            compiler_params=cparams,
        )(x, table, wt, b2)
    else:
        if rng_key is None:
            rng_key = jax.random.PRNGKey(0)
        keep_prob = 1.0 - float(dropout_rate)
        keep = jax.random.bernoulli(rng_key, keep_prob, (Bp, D))
        mask = keep.astype(table.dtype) * jnp.asarray(1.0 / keep_prob, table.dtype)
        mask_spec = pl.BlockSpec((block_rows, D), lambda i, idx: (i, 0))
        kernel = functools.partial(_commander_train_kernel,
                                   block_rows=block_rows, embed_dim=D)
        grid_spec = pltpu.PrefetchScalarGridSpec(
            num_scalar_prefetch=1,
            grid=grid,
            in_specs=[table_spec, wt_spec, b_spec, mask_spec],
            out_specs=out_spec,
        )
        out = pl.pallas_call(
            kernel, out_shape=out_shape, grid_spec=grid_spec,
            compiler_params=cparams,
        )(x, table, wt, b2, mask)

    return out[:B] if Bp != B else out


if __name__ == "__main__":
    # Deterministic synthetic parameters / inputs (no checkpoint loading).
    num_commanders = 16
    embed_dim = 128
    batch = 16

    key = jax.random.PRNGKey(0)
    k_tbl, k_w, k_b, k_idx = jax.random.split(key, 4)
    table = jax.random.normal(k_tbl, (num_commanders, embed_dim), dtype=jnp.float32)
    weight = jax.random.normal(k_w, (embed_dim, 2 * embed_dim), dtype=jnp.float32) * 0.05
    bias = jax.random.normal(k_b, (embed_dim,), dtype=jnp.float32) * 0.05
    x = jax.random.randint(k_idx, (batch, 2), 0, num_commanders, dtype=jnp.int32)

    # Eval-mode forward (nn.Dropout is identity in eval).
    out_eval = commander_embedding(x, table, weight, bias,
                                   dropout_rate=0.2, training=False)
    out_eval = jax.block_until_ready(out_eval)

    # Pure-JAX reference.
    emb = jnp.take(table, x, axis=0)                              # (B, 2, D)
    combined = jnp.concatenate([emb[:, 0], emb[:, 1]], axis=-1)   # (B, 2D)
    ref = jnp.dot(combined, weight.T,
                  precision=jax.lax.Precision.HIGHEST) + bias     # (B, D)
    assert out_eval.shape == (batch, embed_dim)
    assert jnp.allclose(out_eval, ref, atol=2e-3, rtol=2e-3), "eval forward mismatch"

    # Training-mode forward (inverted dropout applied in-kernel via scale mask).
    out_train = commander_embedding(x, table, weight, bias, dropout_rate=0.2,
                                    training=True, rng_key=jax.random.PRNGKey(42))
    out_train = jax.block_until_ready(out_train)
    scaled = out_eval / 0.8
    ok = jnp.all(
        jnp.isclose(out_train, 0.0, atol=1e-6)
        | jnp.isclose(out_train, scaled, atol=1e-3, rtol=1e-3)
    )
    assert bool(ok), "dropout output values inconsistent with inverted dropout"

    print("KERNEL_OK")
</pallas_src>

<mosaic_0001>
module attributes {stable_mosaic.version = 11 : i64} {
  func.func @_commander_eval_kernel(%arg0: i32, %arg1: memref<16x2xi32, #tpu.memory_space<smem>>, %arg2: memref<16x128xf32, #tpu.memory_space<vmem>>, %arg3: memref<256x128xf32, #tpu.memory_space<vmem>>, %arg4: memref<1x128xf32, #tpu.memory_space<vmem>>, %arg5: memref<8x128xf32, #tpu.memory_space<vmem>>) attributes {dimension_semantics = [#tpu.dimension_semantics<parallel>], iteration_bounds = array<i64: 2>, scalar_prefetch = 1 : i64, scratch_operands = 0 : i64, tpu.core_type = #tpu.core_type<tc>, window_params = [{pipeline_mode = #tpu.pipeline_mode<synchronous>, transform_indices = @transform_0, window_bounds = array<i64: 16, 128>}, {pipeline_mode = #tpu.pipeline_mode<synchronous>, transform_indices = @transform_1, window_bounds = array<i64: 256, 128>}, {pipeline_mode = #tpu.pipeline_mode<synchronous>, transform_indices = @transform_2, window_bounds = array<i64: 1, 128>}, {transform_indices = @transform_3, window_bounds = array<i64: 8, 128>}]} {
    %c8_i32 = arith.constant 8 : i32
    %0 = arith.muli %arg0, %c8_i32 : i32
    %c0_i32 = arith.constant 0 : i32
    %1 = arith.addi %0, %c0_i32 : i32
    %2 = arith.index_cast %1 : i32 to index
    %c0 = arith.constant 0 : index
    %3 = memref.load %arg1[%2, %c0] : memref<16x2xi32, #tpu.memory_space<smem>>
    %4 = arith.index_cast %3 : i32 to index
    %c0_0 = arith.constant 0 : index
    %5 = vector.load %arg2[%4, %c0_0] : memref<16x128xf32, #tpu.memory_space<vmem>>, vector<1x128xf32>
    %6 = arith.index_cast %1 : i32 to index
    %c1 = arith.constant 1 : index
    %7 = memref.load %arg1[%6, %c1] : memref<16x2xi32, #tpu.memory_space<smem>>
    %8 = arith.index_cast %7 : i32 to index
    %c0_1 = arith.constant 0 : index
    %9 = vector.load %arg2[%8, %c0_1] : memref<16x128xf32, #tpu.memory_space<vmem>>, vector<1x128xf32>
    %c1_i32 = arith.constant 1 : i32
    %10 = arith.addi %0, %c1_i32 : i32
    %11 = arith.index_cast %10 : i32 to index
    %c0_2 = arith.constant 0 : index
    %12 = memref.load %arg1[%11, %c0_2] : memref<16x2xi32, #tpu.memory_space<smem>>
    %13 = arith.index_cast %12 : i32 to index
    %c0_3 = arith.constant 0 : index
    %14 = vector.load %arg2[%13, %c0_3] : memref<16x128xf32, #tpu.memory_space<vmem>>, vector<1x128xf32>
    %15 = arith.index_cast %10 : i32 to index
    %c1_4 = arith.constant 1 : index
    %16 = memref.load %arg1[%15, %c1_4] : memref<16x2xi32, #tpu.memory_space<smem>>
    %17 = arith.index_cast %16 : i32 to index
    %c0_5 = arith.constant 0 : index
    %18 = vector.load %arg2[%17, %c0_5] : memref<16x128xf32, #tpu.memory_space<vmem>>, vector<1x128xf32>
    %c2_i32 = arith.constant 2 : i32
    %19 = arith.addi %0, %c2_i32 : i32
    %20 = arith.index_cast %19 : i32 to index
    %c0_6 = arith.constant 0 : index
    %21 = memref.load %arg1[%20, %c0_6] : memref<16x2xi32, #tpu.memory_space<smem>>
    %22 = arith.index_cast %21 : i32 to index
    %c0_7 = arith.constant 0 : index
    %23 = vector.load %arg2[%22, %c0_7] : memref<16x128xf32, #tpu.memory_space<vmem>>, vector<1x128xf32>
    %24 = arith.index_cast %19 : i32 to index
    %c1_8 = arith.constant 1 : index
    %25 = memref.load %arg1[%24, %c1_8] : memref<16x2xi32, #tpu.memory_space<smem>>
    %26 = arith.index_cast %25 : i32 to index
    %c0_9 = arith.constant 0 : index
    %27 = vector.load %arg2[%26, %c0_9] : memref<16x128xf32, #tpu.memory_space<vmem>>, vector<1x128xf32>
    %c3_i32 = arith.constant 3 : i32
    %28 = arith.addi %0, %c3_i32 : i32
    %29 = arith.index_cast %28 : i32 to index
    %c0_10 = arith.constant 0 : index
    %30 = memref.load %arg1[%29, %c0_10] : memref<16x2xi32, #tpu.memory_space<smem>>
    %31 = arith.index_cast %30 : i32 to index
    %c0_11 = arith.constant 0 : index
    %32 = vector.load %arg2[%31, %c0_11] : memref<16x128xf32, #tpu.memory_space<vmem>>, vector<1x128xf32>
    %33 = arith.index_cast %28 : i32 to index
    %c1_12 = arith.constant 1 : index
    %34 = memref.load %arg1[%33, %c1_12] : memref<16x2xi32, #tpu.memory_space<smem>>
    %35 = arith.index_cast %34 : i32 to index
    %c0_13 = arith.constant 0 : index
    %36 = vector.load %arg2[%35, %c0_13] : memref<16x128xf32, #tpu.memory_space<vmem>>, vector<1x128xf32>
    %c4_i32 = arith.constant 4 : i32
    %37 = arith.addi %0, %c4_i32 : i32
    %38 = arith.index_cast %37 : i32 to index
    %c0_14 = arith.constant 0 : index
    %39 = memref.load %arg1[%38, %c0_14] : memref<16x2xi32, #tpu.memory_space<smem>>
    %40 = arith.index_cast %39 : i32 to index
    %c0_15 = arith.constant 0 : index
    %41 = vector.load %arg2[%40, %c0_15] : memref<16x128xf32, #tpu.memory_space<vmem>>, vector<1x128xf32>
    %42 = arith.index_cast %37 : i32 to index
    %c1_16 = arith.constant 1 : index
    %43 = memref.load %arg1[%42, %c1_16] : memref<16x2xi32, #tpu.memory_space<smem>>
    %44 = arith.index_cast %43 : i32 to index
    %c0_17 = arith.constant 0 : index
    %45 = vector.load %arg2[%44, %c0_17] : memref<16x128xf32, #tpu.memory_space<vmem>>, vector<1x128xf32>
    %c5_i32 = arith.constant 5 : i32
    %46 = arith.addi %0, %c5_i32 : i32
    %47 = arith.index_cast %46 : i32 to index
    %c0_18 = arith.constant 0 : index
    %48 = memref.load %arg1[%47, %c0_18] : memref<16x2xi32, #tpu.memory_space<smem>>
    %49 = arith.index_cast %48 : i32 to index
    %c0_19 = arith.constant 0 : index
    %50 = vector.load %arg2[%49, %c0_19] : memref<16x128xf32, #tpu.memory_space<vmem>>, vector<1x128xf32>
    %51 = arith.index_cast %46 : i32 to index
    %c1_20 = arith.constant 1 : index
    %52 = memref.load %arg1[%51, %c1_20] : memref<16x2xi32, #tpu.memory_space<smem>>
    %53 = arith.index_cast %52 : i32 to index
    %c0_21 = arith.constant 0 : index
    %54 = vector.load %arg2[%53, %c0_21] : memref<16x128xf32, #tpu.memory_space<vmem>>, vector<1x128xf32>
    %c6_i32 = arith.constant 6 : i32
    %55 = arith.addi %0, %c6_i32 : i32
    %56 = arith.index_cast %55 : i32 to index
    %c0_22 = arith.constant 0 : index
    %57 = memref.load %arg1[%56, %c0_22] : memref<16x2xi32, #tpu.memory_space<smem>>
    %58 = arith.index_cast %57 : i32 to index
    %c0_23 = arith.constant 0 : index
    %59 = vector.load %arg2[%58, %c0_23] : memref<16x128xf32, #tpu.memory_space<vmem>>, vector<1x128xf32>
    %60 = arith.index_cast %55 : i32 to index
    %c1_24 = arith.constant 1 : index
    %61 = memref.load %arg1[%60, %c1_24] : memref<16x2xi32, #tpu.memory_space<smem>>
    %62 = arith.index_cast %61 : i32 to index
    %c0_25 = arith.constant 0 : index
    %63 = vector.load %arg2[%62, %c0_25] : memref<16x128xf32, #tpu.memory_space<vmem>>, vector<1x128xf32>
    %c7_i32 = arith.constant 7 : i32
    %64 = arith.addi %0, %c7_i32 : i32
    %65 = arith.index_cast %64 : i32 to index
    %c0_26 = arith.constant 0 : index
    %66 = memref.load %arg1[%65, %c0_26] : memref<16x2xi32, #tpu.memory_space<smem>>
    %67 = arith.index_cast %66 : i32 to index
    %c0_27 = arith.constant 0 : index
    %68 = vector.load %arg2[%67, %c0_27] : memref<16x128xf32, #tpu.memory_space<vmem>>, vector<1x128xf32>
    %69 = arith.index_cast %64 : i32 to index
    %c1_28 = arith.constant 1 : index
    %70 = memref.load %arg1[%69, %c1_28] : memref<16x2xi32, #tpu.memory_space<smem>>
    %71 = arith.index_cast %70 : i32 to index
    %c0_29 = arith.constant 0 : index
    %72 = vector.load %arg2[%71, %c0_29] : memref<16x128xf32, #tpu.memory_space<vmem>>, vector<1x128xf32>
    %73 = tpu.concatenate %5, %14, %23, %32, %41, %50, %59, %68 in 0 : vector<1x128xf32>, vector<1x128xf32>, vector<1x128xf32>, vector<1x128xf32>, vector<1x128xf32>, vector<1x128xf32>, vector<1x128xf32>, vector<1x128xf32> -> vector<8x128xf32>
    %74 = tpu.concatenate %9, %18, %27, %36, %45, %54, %63, %72 in 0 : vector<1x128xf32>, vector<1x128xf32>, vector<1x128xf32>, vector<1x128xf32>, vector<1x128xf32>, vector<1x128xf32>, vector<1x128xf32>, vector<1x128xf32> -> vector<8x128xf32>
    %c0_30 = arith.constant 0 : index
    %c0_31 = arith.constant 0 : index
    %75 = vector.load %arg3[%c0_30, %c0_31] : memref<256x128xf32, #tpu.memory_space<vmem>>, vector<128x128xf32>
    %c128 = arith.constant 128 : index
    %c0_32 = arith.constant 0 : index
    %76 = vector.load %arg3[%c128, %c0_32] : memref<256x128xf32, #tpu.memory_space<vmem>>, vector<128x128xf32>
    %cst = arith.constant dense<0.000000e+00> : vector<8x128xf32>
    %77 = tpu.matmul %73, %75, %cst {dimension_numbers = #tpu.dot_dimension_numbers<[1], [0], [0], [1], [0, 0, 1, 1], [], []>} : vector<8x128xf32>, vector<128x128xf32>, vector<8x128xf32> -> vector<8x128xf32>
    %cst_33 = arith.constant dense<0.000000e+00> : vector<8x128xf32>
    %78 = tpu.matmul %74, %76, %cst_33 {dimension_numbers = #tpu.dot_dimension_numbers<[1], [0], [0], [1], [0, 0, 1, 1], [], []>} : vector<8x128xf32>, vector<128x128xf32>, vector<8x128xf32> -> vector<8x128xf32>
    %79 = arith.addf %77, %78 : vector<8x128xf32>
    %c0_34 = arith.constant 0 : index
    %c0_35 = arith.constant 0 : index
    %80 = vector.load %arg4[%c0_34, %c0_35] : memref<1x128xf32, #tpu.memory_space<vmem>>, vector<1x128xf32>
    %81 = vector.broadcast %80 : vector<1x128xf32> to vector<8x128xf32>
    %82 = arith.addf %79, %81 : vector<8x128xf32>
    %c0_36 = arith.constant 0 : index
    %c0_37 = arith.constant 0 : index
    %83 = vector.load %arg5[%c0_36, %c0_37] : memref<8x128xf32, #tpu.memory_space<vmem>>, vector<8x128xf32>
    tpu.vector_store %arg5[%c0_36, %c0_37], %82 {strides = array<i32>} : memref<8x128xf32, #tpu.memory_space<vmem>>, vector<8x128xf32>,
    return
  }
  func.func @transform_0(%arg0: i32, %arg1: memref<16x2xi32, #tpu.memory_space<smem>>) -> (i32, i32) {
    %c0_i32 = arith.constant 0 : i32
    %c0_i32_0 = arith.constant 0 : i32
    %c0_i32_1 = arith.constant 0 : i32
    return %c0_i32, %c0_i32_0 : i32, i32
  }
  func.func @transform_1(%arg0: i32, %arg1: memref<16x2xi32, #tpu.memory_space<smem>>) -> (i32, i32) {
    %c0_i32 = arith.constant 0 : i32
    %c0_i32_0 = arith.constant 0 : i32
    %c0_i32_1 = arith.constant 0 : i32
    return %c0_i32, %c0_i32_0 : i32, i32
  }
  func.func @transform_2(%arg0: i32, %arg1: memref<16x2xi32, #tpu.memory_space<smem>>) -> (i32, i32) {
    %c0_i32 = arith.constant 0 : i32
    %c0_i32_0 = arith.constant 0 : i32
    %c0_i32_1 = arith.constant 0 : i32
    return %c0_i32, %c0_i32_0 : i32, i32
  }
  func.func @transform_3(%arg0: i32, %arg1: memref<16x2xi32, #tpu.memory_space<smem>>) -> (i32, i32) {
    %c0_i32 = arith.constant 0 : i32
    %c0_i32_0 = arith.constant 0 : i32
    return %arg0, %c0_i32 : i32, i32
  }
}

</mosaic_0001>

<bundles_post_ra>
// kernel: tpu_custom_call.1
= control target key start
LH: loop header
LB: loop body
LE: loop exit
PB: predicated region body
PF: predicated region fallthrough
CT: control target
= control target key end

     0   :  { %s1208_s0 = inlined_call_operand.vmem [shape: s32[16,2], index: 0, kind: input, shape index: {}]   ;;  %s1209_s1 = inlined_call_operand.vmem [shape: f32[16,128], index: 1, kind: input, shape index: {}]   ;;  %s1210_s2 = inlined_call_operand.hbm [shape: f32[256,128], index: 2, kind: input, shape index: {}]   ;;  %s1211_s3 = inlined_call_operand.vmem [shape: f32[1,128], index: 3, kind: input, shape index: {}]   ;;  %s1212_s4 = inlined_call_operand.hbm [shape: f32[16,128], index: 4, kind: output, shape index: {}]  }
   0x1   :  { %1220 = sst [smem:[#allocation12_spill]] %s1210_s2  ;;  %s9_s17 = sshll.u32 %s1208_s0, 4  ;;  %s10_s17 = int_to_ptr.vmem [resolvable:$true] %s9_s17 }
   0x2   :  { %s777_s18 = scalar_lea.vmem %s10_s17, 256  ;;  %p782_p1 = scmp.lt.s32.totalorder %s10_s17, %s10_s17 }
   0x3   :  { %p778_p0 = scmp.ne.s32.totalorder %s10_s17, %s777_s18  ;;  %p783_p2 = scmp.lt.s32.totalorder %s777_s18, %s777_s18 }
   0x5   :  { %p784_p3 = por %p783_p2, %p782_p1 }
   0x7   :  { %p785_p4 = pnand %p784_p3, %p778_p0 }
   0x9   :  { %788 = shalt.err (!%p785_p4)  }
   0xa   :  { %s883_s19 = smov [#allocation3]  }
   0xb   :  { %12 = dma.vmem_to_smem %s10_s17, 256, %s883_s19, [#allocation2] }
   0xc   :  { %857 = dma.done.wait [#allocation2], 256 }
   0xd   :  { %858 = vsyncadd [#allocation2], 4294967040 }
   0xe   :  { %14 = sfence }
   0xf   :  { %15 = vsyncpa [#allocation5], 0 }
  0x10   :  { %16 = vsyncpa [#allocation6], 0 }
  0x11   :  { %18 = vsyncpa [#allocation6 + $0x1], 0  ;;  %s918_s20 = smov 0   ;;  %s920_s21 = smov 0  }
  0x12   :  { %s922_s0 = smov 0   ;;  %s924_s22 = smov 0  }
  0x13 LB: > { %s939_s23 = sadd.s32 4294967295, %s881_s22   ;;  %s576_s24 = sadd.s32 4294967294, %s881_s22   ;;  %s881_s22 = sphi %s924_s22, %s1238_s22   ;;  %s877_s0 = sphi %s922_s0, %s1237_s0   ;;  %s873_s21 = sphi %s920_s21, %s1236_s21   ;;  %s869_s20 = sphi %s918_s20, %s1235_s20  }
  0x14   : > { %s943_s25 = sadd.s32 1, %s881_s22   ;;  %s94_s26 = sadd.s32 1, %s877_s0 }
  0x15   : > { %s91_s27 = ssub.s32 %s881_s22, %s943_s25  ;;  %p104_p5 = scmp.ne.s32.totalorder %s877_s0, %s873_s21 }
  0x16   : > { %p92_p6 = scmp.eq.s32.totalorder %s91_s27, 0  ;;  %p105_p7 = scmp.eq.s32.totalorder %s939_s23, 1 }
  0x17   : > { %p110_p8 = scmp.ne.s32.totalorder %s873_s21, %s869_s20  ;;  %p111_p9 = scmp.eq.s32.totalorder %s576_s24, 1 }
  0x18   : > { %s954_s28 = scalar_select %p92_p6, %s877_s0, %s94_s26  }
  0x19   : > { %p956_p10 = por %p105_p7, %p104_p5  ;;  %p960_p11 = por %p111_p9, %p110_p8 }
  0x1a   : > { %1221 = sst [smem:[#allocation11_spill]] %s954_s28  ;;  %p577_p12 = scmp.ge.s32.totalorder %s881_s22, 1 }
  0x1b   : > { %s1223_s30 = scalar_select %p960_p11, 1, 0 }
  0x1c   : > { %p118_p13 = scmp.lt.s32.totalorder %s881_s22, 3  ;;  %p736_p0 = scmp.eq.s32.totalorder %s939_s23, 0 }
  0x1d   : > { %s884_s6 = smov [#allocation4]  }
  0x1e   : > { %p967_p1 = pnand %p577_p12, %p118_p13  ;;  %s133_s7 = sshll.u32 %s884_s6, 4  ;;  %s134_s7 = int_to_ptr.vmem [resolvable:$true] %s133_s7 }
  0x1f   : > { %s800_s8 = scalar_lea.vmem %s134_s7, 4096  ;;  %p808_p8 = scmp.lt.s32.totalorder %s134_s7, %s134_s7 }
  0x20   : > { %p728_p2 = pneg %p967_p1  ;;  %p801_p5 = scmp.ne.s32.totalorder %s134_s7, %s800_s8 }
  0x21   : > { %p809_p9 = scmp.lt.s32.totalorder %s800_s8, %s800_s8 }
  0x22   : > { %p729_p3 = pnand %p736_p0, %p728_p2 }
  0x23   : > { %p810_p11 = por %p809_p9, %p808_p8 }
  0x24   : > { %p791_p4 = pneg %p729_p3 }
  0x26   : > { %p803_p6 = pnand %p801_p5, %p791_p4 }
  0x28   : > { %p804_p7 = pneg %p803_p6 }
  0x2a   : > { %p811_p12 = pnand %p810_p11, %p804_p7 }
  0x2c   : > { %814 = shalt.err (!%p811_p12)
}
  0x2d   : > { %s885_s9 = smov 128   ;;  %s886_s10 = smov 8  }
  0x2e   : > { %s1225_s2 = sld [smem:[#allocation12_spill]] }
  0x30   : > { %152 = sbr.rel (%p967_p1) target bundleno = 300 (0x12c), region = 32 }
  0x34   : > { %731 = dma.hbm_to_vmem [thread:$0]  (!%p729_p3), %s1225_s2, 4096, %s134_s7, [#allocation5], %s885_s9, %s885_s9, %s886_s10  }
  0x35   : > { %860 = dma.done.wait (%p736_p0), [#allocation5], 4096  }
  0x36   : > { %862 = vsyncadd (%p736_p0), [#allocation5], 4294963200  ;;  %s985_s13 = sshll.u32 %s939_s23, 10  ;;  %v887_v0 = vmov 0.0   ;;  %vm888_vm0 = vmmov 0   ;;  %v337_v1 = vld [vmem:[#allocation4 + $0xf8] sm:$0xff] }
  0x37   : > { %652 = vmatprep.subr.mxu0 %v887_v0  ;;  %687 = vmatprep.subr.mxu1 %v887_v0  ;;  %s1218_s14 = sadd.s32 128, %s985_s13  ;;  %s176_s15 = sadd.s32 1, %s985_s13  ;;  %v321_v2 = vld [vmem:[#allocation4 + $0x78] sm:$0xff]  ;;  %v336_v3 = vld [vmem:[#allocation4 + $0xf0] sm:$0xff]  ;;  %v335_v5 = vld [vmem:[#allocation4 + $0xe8] sm:$0xff]  ;;  %vm264_vm1 = vcmask 1040384  }
  0x38   : > { %684 = vmatprep.mubr.msk.f32.mxu0 %vm888_vm0, %v887_v0  ;;  %719 = vmatprep.mubr.msk.f32.mxu1 %vm888_vm0, %v887_v0  ;;  %s185_s16 = sadd.s32 1, %s1218_s14  ;;  %s1217_s18 = sadd.s32 256, %s985_s13  ;;  %v320_v4 = vld [vmem:[#allocation4 + $0x70] sm:$0xff]  ;;  %v319_v6 = vld [vmem:[#allocation4 + $0x68] sm:$0xff]  ;;  %v334_v7 = vld [vmem:[#allocation4 + $0xe0] sm:$0xff]  ;;  %vm266_vm2 = vcmask 1041408  }
  0x39   : > { %s995_s17 = sld [smem:[#allocation3 + %s185_s16]]  ;;  %s194_s19 = sadd.s32 1, %s1217_s18  ;;  %653 = vmatpush3.msra.mxu0 %v337_v1  ;;  %688 = vmatpush3.msra.mxu1 %v321_v2  ;;  %v318_v8 = vld [vmem:[#allocation4 + $0x60] sm:$0xff]  ;;  %v333_v9 = vld [vmem:[#allocation4 + $0xd8] sm:$0xff]  ;;  %v332_v11 = vld [vmem:[#allocation4 + $0xd0] sm:$0xff]  ;;  %vm268_vm3 = vcmask 1042432  }
  0x3a   : > { %s1216_s24 = sadd.s32 384, %s985_s13  ;;  %s1001_s26 = sld [smem:[#allocation3 + %s194_s19]]  ;;  %654 = vmatprep.subr.mxu0 %v887_v0  ;;  %689 = vmatprep.subr.mxu1 %v887_v0  ;;  %v317_v10 = vld [vmem:[#allocation4 + $0x58] sm:$0xff]  ;;  %v316_v12 = vld [vmem:[#allocation4 + $0x50] sm:$0xff]  ;;  %v331_v13 = vld [vmem:[#allocation4 + $0xc8] sm:$0xff]  ;;  %vm270_vm4 = vcmask 1043456  }
  0x3b   : > { %s203_s27 = sadd.s32 1, %s1216_s24  ;;  %s1214_s6 = sadd.s32 512, %s985_s13  ;;  %655 = vmatpush3.msra.mxu0 %v336_v3  ;;  %690 = vmatpush3.msra.mxu1 %v320_v4  ;;  %v315_v14 = vld [vmem:[#allocation4 + $0x48] sm:$0xff]  ;;  %v330_v18 = vld [vmem:[#allocation4 + $0xc0] sm:$0xff]  ;;  %v329_v25 = vld [vmem:[#allocation4 + $0xb8] sm:$0xff]  ;;  %vm272_vm5 = vcmask 1044480  }
  0x3c   : > { %s1005_s5 = sld [smem:[#allocation3 + %s203_s27]]  ;;  %s212_s7 = sadd.s32 1, %s1214_s6  ;;  %656 = vmatprep.subr.mxu0 %v887_v0  ;;  %691 = vmatprep.subr.mxu1 %v887_v0  ;;  %v314_v19 = vld [vmem:[#allocation4 + $0x40] sm:$0xff]  ;;  %v313_v26 = vld [vmem:[#allocation4 + $0x38] sm:$0xff]  ;;  %v328_v27 = vld [vmem:[#allocation4 + $0xb0] sm:$0xff]  ;;  %vm274_vm6 = vcmask 1045504  }
  0x3d   : > { %s1213_s8 = sadd.s32 640, %s985_s13  ;;  %s1011_s9 = sld [smem:[#allocation3 + %s176_s15]]  ;;  %657 = vmatpush3.msra.mxu0 %v335_v5  ;;  %692 = vmatpush3.msra.mxu1 %v319_v6  ;;  %v312_v28 = vld [vmem:[#allocation4 + $0x30] sm:$0xff]  ;;  %v327_v38 = vld [vmem:[#allocation4 + $0xa8] sm:$0xff]  ;;  %v326_v44 = vld [vmem:[#allocation4 + $0xa0] sm:$0xff]  ;;  %vm276_vm7 = vcmask 1046528  }
  0x3e   : > { %s1015_s10 = sld [smem:[#allocation3 + %s212_s7]]  ;;  %s221_s11 = sadd.s32 1, %s1213_s8  ;;  %658 = vmatprep.subr.mxu0 %v887_v0  ;;  %693 = vmatprep.subr.mxu1 %v887_v0  ;;  %v311_v39 = vld [vmem:[#allocation4 + $0x28] sm:$0xff]  ;;  %v310_v45 = vld [vmem:[#allocation4 + $0x20] sm:$0xff]  ;;  %v325_v47 = vld [vmem:[#allocation4 + $0x98] sm:$0xff] }
  0x3f   : > { %s1215_s12 = sadd.s32 768, %s985_s13  ;;  %s1022_s15 = sld [smem:[#allocation3 + %s221_s11]]  ;;  %659 = vmatpush3.msra.mxu0 %v334_v7  ;;  %694 = vmatpush3.msra.mxu1 %v318_v8  ;;  %v309_v48 = vld [vmem:[#allocation4 + $0x18] sm:$0xff]  ;;  %v324_v58 = vld [vmem:[#allocation4 + $0x90] sm:$0xff]  ;;  %v323_v4 = vld [vmem:[#allocation4 + $0x88] sm:$0xff] }
  0x40   : > { %s230_s16 = sadd.s32 1, %s1215_s12  ;;  %s187_s7 = scalar_lea.vmem %s1209_s1, %s995_s17  ;;  %660 = vmatprep.subr.mxu0 %v887_v0  ;;  %695 = vmatprep.subr.mxu1 %v887_v0  ;;  %v308_v59 = vld [vmem:[#allocation4 + $0x10] sm:$0xff]  ;;  %v307_v5 = vld [vmem:[#allocation4 + $0x8] sm:$0xff] }
  0x41   : > { %s1030_s8 = sld [smem:[#allocation3 + %s230_s16]]  ;;  %s1219_s11 = sadd.s32 896, %s985_s13  ;;  %661 = vmatpush3.msra.mxu0 %v333_v9  ;;  %696 = vmatpush3.msra.mxu1 %v317_v10  ;;  %v188_v15 = vld [vmem:[%s187_s7] sm:$0x1] }
  0x42   : > { %s1036_s6 = sld [smem:[#allocation3 + %s985_s13]]  ;;  %s196_s17 = scalar_lea.vmem %s1209_s1, %s1001_s26  ;;  %662 = vmatprep.subr.mxu0 %v887_v0  ;;  %697 = vmatprep.subr.mxu1 %v887_v0  ;;  %v279_v22 = vrot.slane %v188_v15, 7  ;;  %v322_v10 = vld [vmem:[#allocation4 + $0x80] sm:$0xff] }
  0x43   : > { %s239_s16 = sadd.s32 1, %s1219_s11  ;;  %s205_s18 = scalar_lea.vmem %s1209_s1, %s1005_s5  ;;  %663 = vmatpush3.msra.mxu0 %v332_v11  ;;  %698 = vmatpush3.msra.mxu1 %v316_v12  ;;  %v197_v16 = vld [vmem:[%s196_s17] sm:$0x1] }
  0x44   : > { %s1050_s14 = sld [smem:[#allocation3 + %s239_s16]]  ;;  %s178_s12 = scalar_lea.vmem %s1209_s1, %s1011_s9  ;;  %v206_v17 = vld [vmem:[%s205_s18] sm:$0x1]  ;;  %664 = vmatprep.subr.mxu0 %v887_v0  ;;  %699 = vmatprep.subr.mxu1 %v887_v0  ;;  %v282_v23 = vrot.slane %v197_v16, 6 }
  0x45   : > { %s1226_s11 = sadd.s32 128, %s985_s13  ;;  %s214_s16 = scalar_lea.vmem %s1209_s1, %s1015_s10  ;;  %v179_v20 = vld [vmem:[%s178_s12] sm:$0x1]  ;;  %665 = vmatpush3.msra.mxu0 %v331_v13  ;;  %700 = vmatpush3.msra.mxu1 %v315_v14  ;;  %v285_v24 = vrot.slane %v206_v17, 5 }
  0x46   : > { %s1058_s2 = sld [smem:[#allocation3 + %s1226_s11]]  ;;  %s1227_s27 = sadd.s32 256, %s985_s13  ;;  %v215_v21 = vld [vmem:[%s214_s16] sm:$0x1]  ;;  %666 = vmatprep.subr.mxu0 %v887_v0  ;;  %701 = vmatprep.subr.mxu1 %v887_v0  ;;  %v299_v30 = vsel %vm264_vm1, %v179_v20, %v279_v22 }
  0x47   : > { %s1068_s28 = sld [smem:[#allocation3 + %s1227_s27]]  ;;  %s223_s10 = scalar_lea.vmem %s1209_s1, %s1022_s15  ;;  %667 = vmatpush3.msra.mxu0 %v330_v18  ;;  %702 = vmatpush3.msra.mxu1 %v314_v19  ;;  %v288_v31 = vrot.slane %v215_v21, 4  ;;  %v300_v32 = vsel %vm266_vm2, %v299_v30, %v282_v23  ;;  %v306_v11 = vld [vmem:[#allocation4] sm:$0xff] }
  0x48   : > { %s174_s17 = scalar_lea.vmem %s1209_s1, %s1036_s6  ;;  %s232_s26 = scalar_lea.vmem %s1209_s1, %s1030_s8  ;;  %v224_v29 = vld [vmem:[%s223_s10] sm:$0x1]  ;;  %668 = vmatprep.subr.mxu0 %v887_v0  ;;  %703 = vmatprep.subr.mxu1 %v887_v0  ;;  %v301_v35 = vsel %vm268_vm3, %v300_v32, %v285_v24 }
  0x49   : > { %s1228_s12 = sadd.s32 384, %s985_s13  ;;  %s1229_s27 = sadd.s32 512, %s985_s13  ;;  %v175_v33 = vld [vmem:[%s174_s17] sm:$0x1]  ;;  %669 = vmatpush3.msra.mxu0 %v329_v25  ;;  %704 = vmatpush3.msra.mxu1 %v313_v26  ;;  %v291_v42 = vrot.slane %v224_v29, 3  ;;  %v302_v46 = vsel %vm270_vm4, %v301_v35, %v288_v31 }
  0x4a   : > { %s1088_s19 = sld [smem:[#allocation3 + %s1228_s12]]  ;;  %s1230_s7 = sadd.s32 640, %s985_s13  ;;  %670 = vmatprep.subr.mxu0 %v887_v0  ;;  %705 = vmatprep.subr.mxu1 %v887_v0  ;;  %v233_v41 = vld [vmem:[%s232_s26] sm:$0x1] }
  0x4b   : > { %s1097_s9 = sld [smem:[#allocation3 + %s1229_s27]]  ;;  %671 = vmatpush3.msra.mxu0 %v328_v27  ;;  %706 = vmatpush3.msra.mxu1 %v312_v28  ;;  %s241_s27 = scalar_lea.vmem %s1209_s1, %s1050_s14  ;;  %v294_v52 = vrot.slane %v233_v41, 2  ;;  %v303_v55 = vsel %vm272_vm5, %v302_v46, %v291_v42  ;;  %v591_v16 = vld [vmem:[%s1211_s3] ss:$0 sm:$0xff] }
  0x4c   : > { %s183_s16 = scalar_lea.vmem %s1209_s1, %s1058_s2  ;;  %s1108_s15 = sld [smem:[#allocation3 + %s1230_s7]]  ;;  %672 = vmatprep.subr.mxu0 %v887_v0  ;;  %707 = vmatprep.subr.mxu1 %v887_v0  ;;  %v242_v51 = vld [vmem:[%s241_s27] sm:$0x1] }
  0x4d   : > { %v184_v34 = vld [vmem:[%s183_s16] sm:$0x1]  ;;  %s192_s18 = scalar_lea.vmem %s1209_s1, %s1068_s28  ;;  %s1231_s2 = sadd.s32 768, %s985_s13  ;;  %673 = vmatpush3.msra.mxu0 %v327_v38  ;;  %708 = vmatpush3.msra.mxu1 %v311_v39  ;;  %v297_v63 = vrot.slane %v242_v51, 1  ;;  %v304_v6 = vsel %vm274_vm6, %v303_v55, %v294_v52 }
  0x4e   : > { %v193_v36 = vld [vmem:[%s192_s18] sm:$0x1]  ;;  %s1113_s24 = sld [smem:[#allocation3 + %s1231_s2]]  ;;  %v244_v37 = vrot.slane %v184_v34, 7  ;;  %s1232_s28 = sadd.s32 896, %s985_s13  ;;  %674 = vmatprep.subr.mxu0 %v887_v0  ;;  %709 = vmatprep.subr.mxu1 %v887_v0 }
  0x4f   : > { %s1119_s17 = sld [smem:[#allocation3 + %s1232_s28]]  ;;  %v247_v40 = vrot.slane %v193_v36, 6  ;;  %675 = vmatpush3.msra.mxu0 %v326_v44  ;;  %710 = vmatpush3.msra.mxu1 %v310_v45  ;;  %v305_v12 = vsel %vm276_vm7, %v304_v6, %v297_v63  ;;  %s593_s27 = sshll.u32 %s939_s23, 7 }
  0x50   : > { %v265_v43 = vsel %vm264_vm1, %v175_v33, %v244_v37  ;;  %s201_s26 = scalar_lea.vmem %s1209_s1, %s1088_s19  ;;  %676 = vmatprep.subr.mxu0 %v887_v0  ;;  %711 = vmatprep.subr.mxu1 %v887_v0  ;;  %s499_s11 = scalar_lea.hbm %s1212_s4, %s593_s27 }
  0x51   : > { %v202_v49 = vld [vmem:[%s201_s26] sm:$0x1]  ;;  %s210_s10 = scalar_lea.vmem %s1209_s1, %s1097_s9  ;;  %v267_v50 = vsel %vm266_vm2, %v265_v43, %v247_v40  ;;  %677 = vmatpush3.msra.mxu0 %v325_v47  ;;  %712 = vmatpush3.msra.mxu1 %v309_v48  ;;  %s889_s18 = smov [#allocation7]  }
  0x52   : > { %v211_v53 = vld [vmem:[%s210_s10] sm:$0x1]  ;;  %s219_s7 = scalar_lea.vmem %s1209_s1, %s1108_s15  ;;  %v250_v54 = vrot.slane %v202_v49, 5  ;;  %678 = vmatprep.subr.mxu0 %v887_v0  ;;  %713 = vmatprep.subr.mxu1 %v887_v0  ;;  %s819_s23 = sshll.u32 %s889_s18, 4  ;;  %s820_s23 = int_to_ptr.vmem [resolvable:$false] %s819_s23 }
  0x53   : > { %v220_v56 = vld [vmem:[%s219_s7] sm:$0x1]  ;;  %v253_v57 = vrot.slane %v211_v53, 4  ;;  %679 = vmatpush3.msra.mxu0 %v324_v58  ;;  %714 = vmatpush3.msra.mxu1 %v308_v59  ;;  %s821_s7 = scalar_lea.vmem %s820_s23, 256 }
  0x54   : > { %s228_s28 = scalar_lea.vmem %s1209_s1, %s1113_s24  ;;  %v256_v61 = vrot.slane %v220_v56, 3  ;;  %v269_v62 = vsel %vm268_vm3, %v267_v50, %v250_v54  ;;  %680 = vmatprep.subr.mxu0 %v887_v0  ;;  %715 = vmatprep.subr.mxu1 %v887_v0  ;;  %s168_s24 = sand.u32 1, %s873_s21  }
  0x55   : > { %v229_v60 = vld [vmem:[%s228_s28] sm:$0x1]  ;;  %s237_s6 = scalar_lea.vmem %s1209_s1, %s1119_s17  ;;  %v271_v3 = vsel %vm270_vm4, %v269_v62, %v253_v57  ;;  %681 = vmatpush3.msra.mxu0 %v323_v4  ;;  %716 = vmatpush3.msra.mxu1 %v307_v5  ;;  %s581_s17 = sshll.u32 %s168_s24, 3 }
  0x56   : > { %v238_v1 = vld [vmem:[%s237_s6] sm:$0x1]  ;;  %v259_v2 = vrot.slane %v229_v60, 2  ;;  %v273_v8 = vsel %vm272_vm5, %v271_v3, %v256_v61  ;;  %682 = vmatprep.subr.mxu0 %v887_v0  ;;  %717 = vmatprep.subr.mxu1 %v887_v0  ;;  %s170_s13 = scalar_lea.vmem [#allocation7], %s581_s17  ;;  %s488_s10 = scalar_lea.sflag [#allocation6], %s168_s24 }
  0x57   : > { %v262_v7 = vrot.slane %v238_v1, 1  ;;  %683 = vmatpush3.msra.mxu0 %v322_v10  ;;  %718 = vmatpush3.msra.mxu1 %v306_v11  ;;  %s501_s8 = sshll.u32 %s170_s13, 4  ;;  %s502_s8 = int_to_ptr.vmem [resolvable:$true] %s501_s8 }
  0x58   : > { %v275_v9 = vsel %vm274_vm6, %v273_v8, %v259_v2  ;;  %685 = vmatmul.mubr.f32.vlgmr.msra.gmra.mxu0 %v305_v12  ;;  %s815_s19 = scalar_lea.vmem %s502_s8, 128  ;;  %p822_p1 = scmp.lt.s32.totalorder %s502_s8, %s820_s23 }
  0x59   : > { %v277_v13 = vsel %vm276_vm7, %v275_v9, %v262_v7  ;;  %p816_p11 = scmp.ne.s32.totalorder %s502_s8, %s815_s19  ;;  %p823_p2 = scmp.lt.s32.totalorder %s821_s7, %s815_s19 }
  0x5a   : > { %720 = vmatmul.mubr.f32.vlgmr.msra.gmra.mxu1 %v277_v13 }
  0x5b   : > { %p817_p13 = pnand %p816_p11, %p956_p10  ;;  %p824_p3 = por %p823_p2, %p822_p1 }
  0x5d   : > { %p818_p0 = pneg %p817_p13 }
  0x5f   : > { %p825_p4 = pnand %p824_p3, %p818_p0 }
 0x118   : > { %v404_v14 = vpop.f32.mrf.mxu0 }
 0x11a   : > { %v474_v15 = vpop.f32.mrf.mxu1  ;;  %v686_v18 = vpop.f32.mrf.mxu0 }
 0x11b   : > { %v475_v17 = vadd.f32 %v474_v15, %v404_v14 }
 0x11c   : > { %v721_v19 = vpop.f32.mrf.mxu1 }
 0x11d   : > { %v485_v0 = vadd.f32 %v591_v16, %v475_v17 }
 0x11f   : > { %486 = vst [vmem:[%s170_s13] sm:$0xff] %v485_v0 }
 0x120   : > { %828 = shalt.err (!%p825_p4)
}
 0x121   : > { %s829_s9 = scalar_lea.hbm %s499_s11, 128  ;;  %s833_s15 = scalar_lea.hbm %s1212_s4, 256 }
 0x122   : > { %p830_p5 = scmp.ne.s32.totalorder %s499_s11, %s829_s9  ;;  %p834_p8 = scmp.lt.s32.totalorder %s499_s11, %s1212_s4 }
 0x123   : > { %p835_p9 = scmp.lt.s32.totalorder %s833_s15, %s829_s9 }
 0x124   : > { %p831_p6 = pnand %p830_p5, %p956_p10 }
 0x125   : > { %p836_p12 = por %p835_p9, %p834_p8 }
 0x126   : > { %p832_p7 = pneg %p831_p6 }
 0x128   : > { %p837_p11 = pnand %p836_p12, %p832_p7 }
 0x12a   : > { %840 = shalt.err (!%p837_p11)
}
 0x12b   : > { %726 = dma.vmem_to_hbm [thread:$0]  (%p956_p10), %s502_s8, 128, %s499_s11, %s488_s10  }
 0x12c PF: > { %p738_p13 = scmp.ge.s32.totalorder %s881_s22, 2  ;;  %s513_s24 = sand.u32 1, %s869_s20  }
 0x12d   : > { %p1233_p0 = scmp.ne.s32.totalorder %s1223_s30, 0  ;;  %s514_s17 = scalar_lea.sflag [#allocation6], %s513_s24 }
 0x12f   : > { %p733_p1 = pnand %p738_p13, %p1233_p0 }
 0x131   : > { %p734_p2 = pneg %p733_p1 }
 0x133   : > { %864 = dma.done.wait (%p734_p2), %s514_s17, 128  }
 0x134   : > { %866 = vsyncadd (%p734_p2), %s514_s17, 4294967168  ;;  %s1234_s5 = sld [smem:[#allocation11_spill]]  ;;  %p21_p3 = scmp.ge.s32.totalorder %s943_s25, 4  }
 0x135   : > { %s1235_s20 = smov %s873_s21  ;;  %s1236_s21 = smov %s877_s0 }
 0x136   : > { %s1238_s22 = smov %s943_s25  ;;  %23 = sbr.rel (!%p21_p3) target bundleno = 19 (0x13), region = 85 }
 0x13a   : > { %s1237_s0 = smov %s1234_s5 }
 0x13b   :  { %519 = vsyncpa [#allocation5], 1 }
 0x13c   :  { %521 = vsyncpa [#allocation5 + $0x1], 1 }
 0x13d   :  { %522 = vsyncpa [#allocation6], 1 }
 0x13e   :  { %524 = vsyncpa [#allocation6 + $0x1], 1 }

</bundles_post_ra>
